<compile_context>
chip_gen: v7x
topology: tpu7x:2x2x1
jax: 0.10.0
libtpu: 0.0.40
codegen_flags: <defaults>
</compile_context>

<pallas_src>
import functools

import jax
import jax.numpy as jnp
import numpy as np
from jax import lax
from jax.experimental import pallas as pl
from jax.experimental.pallas import tpu as pltpu


# ---------------------------------------------------------------------------
# helper reproducing mobile_cv's hp.get_divisible_by
# ---------------------------------------------------------------------------
def get_divisible_by(num, divisor):
    ret = max(divisor, int(num + divisor / 2) // divisor * divisor)
    if ret < 0.9 * num:
        ret += divisor
    return ret


# ---------------------------------------------------------------------------
# in-kernel 3x3 depthwise conv on channels-on-sublanes / spatial-on-lanes data
# ---------------------------------------------------------------------------
def _dw3x3(x, w_all, bias, masks, H, W):
    """3x3 depthwise conv, stride 1, zero pad 1.

    x     : (C, H*W)  f32  activations (spatial flattened onto lanes)
    w_all : (9*C, 1)  f32  tap-major depthwise weights (BN scale pre-folded)
    bias  : (C, 1)    f32  folded BN bias
    masks : (9, H*W)  f32  per-tap halo masks (zero where the tap reads pad)
    """
    C, HW = x.shape
    # centre tap (dy=0, dx=0): no mask, seeds the accumulator.
    acc = x * w_all[4 * C:5 * C, :]
    for k in range(9):
        if k == 4:
            continue
        dy = k // 3 - 1
        dx = k % 3 - 1
        off = dy * W + dx                                  # flattened read offset
        # out[i] = x[i + off]  (wrapped elements are zeroed by the mask)
        shifted = pltpu.roll(x, shift=(-off) % HW, axis=1)
        acc = acc + (shifted * masks[k:k + 1, :]) * w_all[k * C:(k + 1) * C, :]
    return acc + bias


# ---------------------------------------------------------------------------
# Pallas kernel: whole SGBlock fused, one batch element per grid step.
# ---------------------------------------------------------------------------
def sg_block_kernel(x_ref, dw1_w_ref, dw1_b_ref, wc_ref, bc_ref,
                    dw2_w_ref, dw2_b_ref, masks_ref, out_ref, *, H, W):
    x = x_ref[0].astype(jnp.float32)                       # (Cin, H*W)
    masks = masks_ref[...]                                 # (9, H*W)

    # ---- dw1: 3x3 depthwise + folded BN + ReLU -----------------------------
    y1 = jnp.maximum(_dw3x3(x, dw1_w_ref[...], dw1_b_ref[...], masks, H, W), 0.0)

    # ---- pwl o pw: both 1x1 convs + BNs folded to one Cin->Cout matmul -----
    y3 = jnp.dot(wc_ref[...], y1, preferred_element_type=jnp.float32)
    y3 = jnp.maximum(y3 + bc_ref[...], 0.0)                # (Cout, H*W)

    # ---- dw2: 3x3 depthwise + folded BN (no ReLU) --------------------------
    y4 = _dw3x3(y3, dw2_w_ref[...], dw2_b_ref[...], masks, H, W)

    # ---- residual (in_channels == out_channels, stride == 1) ---------------
    out_ref[0] = (y4 + x).astype(out_ref.dtype)


# ---------------------------------------------------------------------------
# host-side, one-time parameter folding
# ---------------------------------------------------------------------------
def _tap_masks(H, W):
    m = np.zeros((9, H, W), np.float32)
    for k in range(9):
        dy = k // 3 - 1
        dx = k % 3 - 1
        m[k, max(0, -dy):min(H, H - dy), max(0, -dx):min(W, W - dx)] = 1.0
    return jnp.asarray(m.reshape(9, H * W))


def fold_params(p, H, W):
    hi = lax.Precision.HIGHEST
    cin = p["dw1_w"].shape[1]
    cout = p["pw_w"].shape[1]
    pwl_ws = p["pwl_w"] * p["pwl_s"]                        # (Cin, Cmid)
    pw_ws = p["pw_w"] * p["pw_s"]                           # (Cmid, Cout)
    wc = jnp.dot(pwl_ws, pw_ws, precision=hi)               # (Cin, Cout)
    bc = jnp.dot(p["pwl_b"], pw_ws, precision=hi) + p["pw_b"]  # (1, Cout)
    return {
        "dw1_w": (p["dw1_w"] * p["dw1_s"]).reshape(9 * cin, 1),
        "dw1_b": p["dw1_b"].reshape(cin, 1),
        "wc_t": wc.T,                                       # (Cout, Cin)
        "bc": bc.reshape(cout, 1),
        "dw2_w": (p["dw2_w"] * p["dw2_s"]).reshape(9 * cout, 1),
        "dw2_b": p["dw2_b"].reshape(cout, 1),
        "masks": _tap_masks(H, W),
    }


# ---------------------------------------------------------------------------
# wrapper: NCHW in / NCHW out, no transposes (reshapes only)
# ---------------------------------------------------------------------------
def sg_block_forward(x_nchw, fp):
    N, Cin, H, W = x_nchw.shape
    Cout = fp["wc_t"].shape[0]
    HW = H * W
    x = x_nchw.reshape(N, Cin, HW)                          # free reshape

    kernel = functools.partial(sg_block_kernel, H=H, W=W)
    out = pl.pallas_call(
        kernel,
        out_shape=jax.ShapeDtypeStruct((N, Cout, HW), x_nchw.dtype),
        grid_spec=pltpu.PrefetchScalarGridSpec(
            num_scalar_prefetch=0,
            grid=(N,),
            in_specs=[
                pl.BlockSpec((1, Cin, HW), lambda n: (n, 0, 0)),
                pl.BlockSpec((9 * Cin, 1), lambda n: (0, 0)),
                pl.BlockSpec((Cin, 1), lambda n: (0, 0)),
                pl.BlockSpec((Cout, Cin), lambda n: (0, 0)),
                pl.BlockSpec((Cout, 1), lambda n: (0, 0)),
                pl.BlockSpec((9 * Cout, 1), lambda n: (0, 0)),
                pl.BlockSpec((Cout, 1), lambda n: (0, 0)),
                pl.BlockSpec((9, HW), lambda n: (0, 0)),
            ],
            out_specs=pl.BlockSpec((1, Cout, HW), lambda n: (n, 0, 0)),
        ),
        compiler_params=pltpu.CompilerParams(dimension_semantics=("parallel",)),
    )(x, fp["dw1_w"], fp["dw1_b"], fp["wc_t"], fp["bc"],
      fp["dw2_w"], fp["dw2_b"], fp["masks"])

    return out.reshape(N, Cout, H, W)                       # free reshape


# ---------------------------------------------------------------------------
# pure-JAX reference (same folded-BN eval semantics) for verification
# ---------------------------------------------------------------------------
def sg_block_reference(x_nchw, p):
    x = jnp.transpose(x_nchw, (0, 2, 3, 1))
    dn = ("NHWC", "HWIO", "NHWC")

    def dwconv(v, w9):
        C = v.shape[-1]
        w = w9.reshape(3, 3, 1, C)
        return lax.conv_general_dilated(v, w, (1, 1), "SAME",
                                        dimension_numbers=dn,
                                        feature_group_count=C,
                                        precision=lax.Precision.HIGHEST)

    def pconv(v, w):
        return lax.conv_general_dilated(v, w.reshape(1, 1, *w.shape), (1, 1),
                                        "SAME", dimension_numbers=dn,
                                        precision=lax.Precision.HIGHEST)

    y = jnp.maximum(dwconv(x, p["dw1_w"]) * p["dw1_s"] + p["dw1_b"], 0.0)
    y = pconv(y, p["pwl_w"]) * p["pwl_s"] + p["pwl_b"]
    y = jnp.maximum(pconv(y, p["pw_w"]) * p["pw_s"] + p["pw_b"], 0.0)
    y = dwconv(y, p["dw2_w"]) * p["dw2_s"] + p["dw2_b"]
    y = y + x
    return jnp.transpose(y, (0, 3, 1, 2))


# ---------------------------------------------------------------------------
# deterministic parameter construction (raw per-layer params)
# ---------------------------------------------------------------------------
def make_params(key, cin, cmid, cout, eps=1e-5):
    ks = list(jax.random.split(key, 16))

    def bn_fold(k, c):
        k1, k2, k3, k4 = jax.random.split(k, 4)
        gamma = 1.0 + 0.1 * jax.random.normal(k1, (1, c), jnp.float32)
        beta = 0.1 * jax.random.normal(k2, (1, c), jnp.float32)
        mean = 0.1 * jax.random.normal(k3, (1, c), jnp.float32)
        var = 0.5 + jax.random.uniform(k4, (1, c), jnp.float32)
        scale = gamma / jnp.sqrt(var + eps)
        bias = beta - mean * scale
        return scale, bias

    p = {}
    p["dw1_w"] = 0.2 * jax.random.normal(ks[0], (9, cin), jnp.float32)
    p["dw1_s"], p["dw1_b"] = bn_fold(ks[1], cin)
    p["pwl_w"] = 0.2 * jax.random.normal(ks[2], (cin, cmid), jnp.float32)
    p["pwl_s"], p["pwl_b"] = bn_fold(ks[3], cmid)
    p["pw_w"] = 0.2 * jax.random.normal(ks[4], (cmid, cout), jnp.float32)
    p["pw_s"], p["pw_b"] = bn_fold(ks[5], cout)
    p["dw2_w"] = 0.2 * jax.random.normal(ks[6], (9, cout), jnp.float32)
    p["dw2_s"], p["dw2_b"] = bn_fold(ks[7], cout)
    return p


if __name__ == "__main__":
    # SGBlock(in_channels=16, out_channels=16, expansion=2, kernel_size=3,
    #         stride=1, width_divisor=8) -> mid_channels = 8, residual add,
    #         no SE, no upsample.
    N, Cin, H, W = 2, 16, 16, 16
    Cout = 16
    expansion = 2
    Cmid = get_divisible_by(Cin // expansion, 8)            # = 8

    key = jax.random.PRNGKey(0)
    kx, kp = jax.random.split(key)
    x = jax.random.normal(kx, (N, Cin, H, W), jnp.float32)  # NCHW like PyTorch
    params = make_params(kp, Cin, Cmid, Cout)
    folded = fold_params(params, H, W)                      # one-time fold

    out = jax.block_until_ready(sg_block_forward(x, folded))
    ref = jax.block_until_ready(sg_block_reference(x, params))
    np.testing.assert_allclose(np.asarray(out), np.asarray(ref),
                               rtol=2e-3, atol=2e-3)
    assert out.shape == (N, Cout, H, W)

    # TODO(synk): SE path, drop-connect and upsample variants are not exercised
    # (disabled by the module's default arguments used here: se_args=None,
    # stride=1, drop_connect_rate=None).
    print("KERNEL_OK")
</pallas_src>

<mosaic_0001>
module attributes {stable_mosaic.version = 11 : i64} {
  func.func @sg_block_kernel(%arg0: i32, %arg1: memref<1x16x256xf32, #tpu.memory_space<vmem>>, %arg2: memref<144x1xf32, #tpu.memory_space<vmem>>, %arg3: memref<16x1xf32, #tpu.memory_space<vmem>>, %arg4: memref<16x16xf32, #tpu.memory_space<vmem>>, %arg5: memref<16x1xf32, #tpu.memory_space<vmem>>, %arg6: memref<144x1xf32, #tpu.memory_space<vmem>>, %arg7: memref<16x1xf32, #tpu.memory_space<vmem>>, %arg8: memref<9x256xf32, #tpu.memory_space<vmem>>, %arg9: memref<1x16x256xf32, #tpu.memory_space<vmem>>) attributes {dimension_semantics = [#tpu.dimension_semantics<parallel>], iteration_bounds = array<i64: 2>, scalar_prefetch = 0 : i64, scratch_operands = 0 : i64, tpu.core_type = #tpu.core_type<tc>, window_params = [{transform_indices = @transform_0, window_bounds = array<i64: 1, 16, 256>}, {pipeline_mode = #tpu.pipeline_mode<synchronous>, transform_indices = @transform_1, window_bounds = array<i64: 144, 1>}, {pipeline_mode = #tpu.pipeline_mode<synchronous>, transform_indices = @transform_2, window_bounds = array<i64: 16, 1>}, {pipeline_mode = #tpu.pipeline_mode<synchronous>, transform_indices = @transform_3, window_bounds = array<i64: 16, 16>}, {pipeline_mode = #tpu.pipeline_mode<synchronous>, transform_indices = @transform_4, window_bounds = array<i64: 16, 1>}, {pipeline_mode = #tpu.pipeline_mode<synchronous>, transform_indices = @transform_5, window_bounds = array<i64: 144, 1>}, {pipeline_mode = #tpu.pipeline_mode<synchronous>, transform_indices = @transform_6, window_bounds = array<i64: 16, 1>}, {pipeline_mode = #tpu.pipeline_mode<synchronous>, transform_indices = @transform_7, window_bounds = array<i64: 9, 256>}, {transform_indices = @transform_8, window_bounds = array<i64: 1, 16, 256>}]} {
    %c0 = arith.constant 0 : index
    %c0_0 = arith.constant 0 : index
    %c0_1 = arith.constant 0 : index
    %0 = vector.load %arg1[%c0, %c0_0, %c0_1] : memref<1x16x256xf32, #tpu.memory_space<vmem>>, vector<1x16x256xf32>
    %1 = vector.shape_cast %0 : vector<1x16x256xf32> to vector<16x256xf32>
    %c0_2 = arith.constant 0 : index
    %c0_3 = arith.constant 0 : index
    %2 = vector.load %arg8[%c0_2, %c0_3] : memref<9x256xf32, #tpu.memory_space<vmem>>, vector<9x256xf32>
    %c0_4 = arith.constant 0 : index
    %c0_5 = arith.constant 0 : index
    %3 = vector.load %arg2[%c0_4, %c0_5] : memref<144x1xf32, #tpu.memory_space<vmem>>, vector<144x1xf32>
    %c0_6 = arith.constant 0 : index
    %c0_7 = arith.constant 0 : index
    %4 = vector.load %arg3[%c0_6, %c0_7] : memref<16x1xf32, #tpu.memory_space<vmem>>, vector<16x1xf32>
    %5 = vector.extract_strided_slice %3 {offsets = [64, 0], sizes = [16, 1], strides = [1, 1]} : vector<144x1xf32> to vector<16x1xf32>
    %6 = vector.broadcast %5 : vector<16x1xf32> to vector<16x256xf32>
    %7 = arith.mulf %1, %6 : vector<16x256xf32>
    %c17_i32 = arith.constant 17 : i32
    %8 = tpu.dynamic_rotate %1 by %c17_i32 dim 1 : vector<16x256xf32>, i32 -> vector<16x256xf32>
    %9 = vector.extract_strided_slice %2 {offsets = [0, 0], sizes = [1, 256], strides = [1, 1]} : vector<9x256xf32> to vector<1x256xf32>
    %10 = vector.broadcast %9 : vector<1x256xf32> to vector<16x256xf32>
    %11 = arith.mulf %8, %10 : vector<16x256xf32>
    %12 = vector.extract_strided_slice %3 {offsets = [0, 0], sizes = [16, 1], strides = [1, 1]} : vector<144x1xf32> to vector<16x1xf32>
    %13 = vector.broadcast %12 : vector<16x1xf32> to vector<16x256xf32>
    %14 = arith.mulf %11, %13 : vector<16x256xf32>
    %15 = arith.addf %7, %14 : vector<16x256xf32>
    %c16_i32 = arith.constant 16 : i32
    %16 = tpu.dynamic_rotate %1 by %c16_i32 dim 1 : vector<16x256xf32>, i32 -> vector<16x256xf32>
    %17 = vector.extract_strided_slice %2 {offsets = [1, 0], sizes = [1, 256], strides = [1, 1]} : vector<9x256xf32> to vector<1x256xf32>
    %18 = vector.broadcast %17 : vector<1x256xf32> to vector<16x256xf32>
    %19 = arith.mulf %16, %18 : vector<16x256xf32>
    %20 = vector.extract_strided_slice %3 {offsets = [16, 0], sizes = [16, 1], strides = [1, 1]} : vector<144x1xf32> to vector<16x1xf32>
    %21 = vector.broadcast %20 : vector<16x1xf32> to vector<16x256xf32>
    %22 = arith.mulf %19, %21 : vector<16x256xf32>
    %23 = arith.addf %15, %22 : vector<16x256xf32>
    %c15_i32 = arith.constant 15 : i32
    %24 = tpu.dynamic_rotate %1 by %c15_i32 dim 1 : vector<16x256xf32>, i32 -> vector<16x256xf32>
    %25 = vector.extract_strided_slice %2 {offsets = [2, 0], sizes = [1, 256], strides = [1, 1]} : vector<9x256xf32> to vector<1x256xf32>
    %26 = vector.broadcast %25 : vector<1x256xf32> to vector<16x256xf32>
    %27 = arith.mulf %24, %26 : vector<16x256xf32>
    %28 = vector.extract_strided_slice %3 {offsets = [32, 0], sizes = [16, 1], strides = [1, 1]} : vector<144x1xf32> to vector<16x1xf32>
    %29 = vector.broadcast %28 : vector<16x1xf32> to vector<16x256xf32>
    %30 = arith.mulf %27, %29 : vector<16x256xf32>
    %31 = arith.addf %23, %30 : vector<16x256xf32>
    %c1_i32 = arith.constant 1 : i32
    %32 = tpu.dynamic_rotate %1 by %c1_i32 dim 1 : vector<16x256xf32>, i32 -> vector<16x256xf32>
    %33 = vector.extract_strided_slice %2 {offsets = [3, 0], sizes = [1, 256], strides = [1, 1]} : vector<9x256xf32> to vector<1x256xf32>
    %34 = vector.broadcast %33 : vector<1x256xf32> to vector<16x256xf32>
    %35 = arith.mulf %32, %34 : vector<16x256xf32>
    %36 = vector.extract_strided_slice %3 {offsets = [48, 0], sizes = [16, 1], strides = [1, 1]} : vector<144x1xf32> to vector<16x1xf32>
    %37 = vector.broadcast %36 : vector<16x1xf32> to vector<16x256xf32>
    %38 = arith.mulf %35, %37 : vector<16x256xf32>
    %39 = arith.addf %31, %38 : vector<16x256xf32>
    %c255_i32 = arith.constant 255 : i32
    %40 = tpu.dynamic_rotate %1 by %c255_i32 dim 1 : vector<16x256xf32>, i32 -> vector<16x256xf32>
    %41 = vector.extract_strided_slice %2 {offsets = [5, 0], sizes = [1, 256], strides = [1, 1]} : vector<9x256xf32> to vector<1x256xf32>
    %42 = vector.broadcast %41 : vector<1x256xf32> to vector<16x256xf32>
    %43 = arith.mulf %40, %42 : vector<16x256xf32>
    %44 = vector.extract_strided_slice %3 {offsets = [80, 0], sizes = [16, 1], strides = [1, 1]} : vector<144x1xf32> to vector<16x1xf32>
    %45 = vector.broadcast %44 : vector<16x1xf32> to vector<16x256xf32>
    %46 = arith.mulf %43, %45 : vector<16x256xf32>
    %47 = arith.addf %39, %46 : vector<16x256xf32>
    %c241_i32 = arith.constant 241 : i32
    %48 = tpu.dynamic_rotate %1 by %c241_i32 dim 1 : vector<16x256xf32>, i32 -> vector<16x256xf32>
    %49 = vector.extract_strided_slice %2 {offsets = [6, 0], sizes = [1, 256], strides = [1, 1]} : vector<9x256xf32> to vector<1x256xf32>
    %50 = vector.broadcast %49 : vector<1x256xf32> to vector<16x256xf32>
    %51 = arith.mulf %48, %50 : vector<16x256xf32>
    %52 = vector.extract_strided_slice %3 {offsets = [96, 0], sizes = [16, 1], strides = [1, 1]} : vector<144x1xf32> to vector<16x1xf32>
    %53 = vector.broadcast %52 : vector<16x1xf32> to vector<16x256xf32>
    %54 = arith.mulf %51, %53 : vector<16x256xf32>
    %55 = arith.addf %47, %54 : vector<16x256xf32>
    %c240_i32 = arith.constant 240 : i32
    %56 = tpu.dynamic_rotate %1 by %c240_i32 dim 1 : vector<16x256xf32>, i32 -> vector<16x256xf32>
    %57 = vector.extract_strided_slice %2 {offsets = [7, 0], sizes = [1, 256], strides = [1, 1]} : vector<9x256xf32> to vector<1x256xf32>
    %58 = vector.broadcast %57 : vector<1x256xf32> to vector<16x256xf32>
    %59 = arith.mulf %56, %58 : vector<16x256xf32>
    %60 = vector.extract_strided_slice %3 {offsets = [112, 0], sizes = [16, 1], strides = [1, 1]} : vector<144x1xf32> to vector<16x1xf32>
    %61 = vector.broadcast %60 : vector<16x1xf32> to vector<16x256xf32>
    %62 = arith.mulf %59, %61 : vector<16x256xf32>
    %63 = arith.addf %55, %62 : vector<16x256xf32>
    %c239_i32 = arith.constant 239 : i32
    %64 = tpu.dynamic_rotate %1 by %c239_i32 dim 1 : vector<16x256xf32>, i32 -> vector<16x256xf32>
    %65 = vector.extract_strided_slice %2 {offsets = [8, 0], sizes = [1, 256], strides = [1, 1]} : vector<9x256xf32> to vector<1x256xf32>
    %66 = vector.broadcast %65 : vector<1x256xf32> to vector<16x256xf32>
    %67 = arith.mulf %64, %66 : vector<16x256xf32>
    %68 = vector.extract_strided_slice %3 {offsets = [128, 0], sizes = [16, 1], strides = [1, 1]} : vector<144x1xf32> to vector<16x1xf32>
    %69 = vector.broadcast %68 : vector<16x1xf32> to vector<16x256xf32>
    %70 = arith.mulf %67, %69 : vector<16x256xf32>
    %71 = arith.addf %63, %70 : vector<16x256xf32>
    %72 = vector.broadcast %4 : vector<16x1xf32> to vector<16x256xf32>
    %73 = arith.addf %71, %72 : vector<16x256xf32>
    %cst = arith.constant 0.000000e+00 : f32
    %74 = vector.broadcast %cst : f32 to vector<16x256xf32>
    %75 = arith.maximumf %73, %74 : vector<16x256xf32>
    %c0_8 = arith.constant 0 : index
    %c0_9 = arith.constant 0 : index
    %76 = vector.load %arg4[%c0_8, %c0_9] : memref<16x16xf32, #tpu.memory_space<vmem>>, vector<16x16xf32>
    %cst_10 = arith.constant dense<0.000000e+00> : vector<16x256xf32>
    %77 = tpu.matmul %76, %75, %cst_10 {dimension_numbers = #tpu.dot_dimension_numbers<[1], [0], [0], [1], [0, 0, 1, 1], [], []>} : vector<16x16xf32>, vector<16x256xf32>, vector<16x256xf32> -> vector<16x256xf32>
    %c0_11 = arith.constant 0 : index
    %c0_12 = arith.constant 0 : index
    %78 = vector.load %arg5[%c0_11, %c0_12] : memref<16x1xf32, #tpu.memory_space<vmem>>, vector<16x1xf32>
    %79 = vector.broadcast %78 : vector<16x1xf32> to vector<16x256xf32>
    %80 = arith.addf %77, %79 : vector<16x256xf32>
    %cst_13 = arith.constant 0.000000e+00 : f32
    %81 = vector.broadcast %cst_13 : f32 to vector<16x256xf32>
    %82 = arith.maximumf %80, %81 : vector<16x256xf32>
    %c0_14 = arith.constant 0 : index
    %c0_15 = arith.constant 0 : index
    %83 = vector.load %arg6[%c0_14, %c0_15] : memref<144x1xf32, #tpu.memory_space<vmem>>, vector<144x1xf32>
    %c0_16 = arith.constant 0 : index
    %c0_17 = arith.constant 0 : index
    %84 = vector.load %arg7[%c0_16, %c0_17] : memref<16x1xf32, #tpu.memory_space<vmem>>, vector<16x1xf32>
    %85 = vector.extract_strided_slice %83 {offsets = [64, 0], sizes = [16, 1], strides = [1, 1]} : vector<144x1xf32> to vector<16x1xf32>
    %86 = vector.broadcast %85 : vector<16x1xf32> to vector<16x256xf32>
    %87 = arith.mulf %82, %86 : vector<16x256xf32>
    %c17_i32_18 = arith.constant 17 : i32
    %88 = tpu.dynamic_rotate %82 by %c17_i32_18 dim 1 : vector<16x256xf32>, i32 -> vector<16x256xf32>
    %89 = vector.extract_strided_slice %2 {offsets = [0, 0], sizes = [1, 256], strides = [1, 1]} : vector<9x256xf32> to vector<1x256xf32>
    %90 = vector.broadcast %89 : vector<1x256xf32> to vector<16x256xf32>
    %91 = arith.mulf %88, %90 : vector<16x256xf32>
    %92 = vector.extract_strided_slice %83 {offsets = [0, 0], sizes = [16, 1], strides = [1, 1]} : vector<144x1xf32> to vector<16x1xf32>
    %93 = vector.broadcast %92 : vector<16x1xf32> to vector<16x256xf32>
    %94 = arith.mulf %91, %93 : vector<16x256xf32>
    %95 = arith.addf %87, %94 : vector<16x256xf32>
    %c16_i32_19 = arith.constant 16 : i32
    %96 = tpu.dynamic_rotate %82 by %c16_i32_19 dim 1 : vector<16x256xf32>, i32 -> vector<16x256xf32>
    %97 = vector.extract_strided_slice %2 {offsets = [1, 0], sizes = [1, 256], strides = [1, 1]} : vector<9x256xf32> to vector<1x256xf32>
    %98 = vector.broadcast %97 : vector<1x256xf32> to vector<16x256xf32>
    %99 = arith.mulf %96, %98 : vector<16x256xf32>
    %100 = vector.extract_strided_slice %83 {offsets = [16, 0], sizes = [16, 1], strides = [1, 1]} : vector<144x1xf32> to vector<16x1xf32>
    %101 = vector.broadcast %100 : vector<16x1xf32> to vector<16x256xf32>
    %102 = arith.mulf %99, %101 : vector<16x256xf32>
    %103 = arith.addf %95, %102 : vector<16x256xf32>
    %c15_i32_20 = arith.constant 15 : i32
    %104 = tpu.dynamic_rotate %82 by %c15_i32_20 dim 1 : vector<16x256xf32>, i32 -> vector<16x256xf32>
    %105 = vector.extract_strided_slice %2 {offsets = [2, 0], sizes = [1, 256], strides = [1, 1]} : vector<9x256xf32> to vector<1x256xf32>
    %106 = vector.broadcast %105 : vector<1x256xf32> to vector<16x256xf32>
    %107 = arith.mulf %104, %106 : vector<16x256xf32>
    %108 = vector.extract_strided_slice %83 {offsets = [32, 0], sizes = [16, 1], strides = [1, 1]} : vector<144x1xf32> to vector<16x1xf32>
    %109 = vector.broadcast %108 : vector<16x1xf32> to vector<16x256xf32>
    %110 = arith.mulf %107, %109 : vector<16x256xf32>
    %111 = arith.addf %103, %110 : vector<16x256xf32>
    %c1_i32_21 = arith.constant 1 : i32
    %112 = tpu.dynamic_rotate %82 by %c1_i32_21 dim 1 : vector<16x256xf32>, i32 -> vector<16x256xf32>
    %113 = vector.extract_strided_slice %2 {offsets = [3, 0], sizes = [1, 256], strides = [1, 1]} : vector<9x256xf32> to vector<1x256xf32>
    %114 = vector.broadcast %113 : vector<1x256xf32> to vector<16x256xf32>
    %115 = arith.mulf %112, %114 : vector<16x256xf32>
    %116 = vector.extract_strided_slice %83 {offsets = [48, 0], sizes = [16, 1], strides = [1, 1]} : vector<144x1xf32> to vector<16x1xf32>
    %117 = vector.broadcast %116 : vector<16x1xf32> to vector<16x256xf32>
    %118 = arith.mulf %115, %117 : vector<16x256xf32>
    %119 = arith.addf %111, %118 : vector<16x256xf32>
    %c255_i32_22 = arith.constant 255 : i32
    %120 = tpu.dynamic_rotate %82 by %c255_i32_22 dim 1 : vector<16x256xf32>, i32 -> vector<16x256xf32>
    %121 = vector.extract_strided_slice %2 {offsets = [5, 0], sizes = [1, 256], strides = [1, 1]} : vector<9x256xf32> to vector<1x256xf32>
    %122 = vector.broadcast %121 : vector<1x256xf32> to vector<16x256xf32>
    %123 = arith.mulf %120, %122 : vector<16x256xf32>
    %124 = vector.extract_strided_slice %83 {offsets = [80, 0], sizes = [16, 1], strides = [1, 1]} : vector<144x1xf32> to vector<16x1xf32>
    %125 = vector.broadcast %124 : vector<16x1xf32> to vector<16x256xf32>
    %126 = arith.mulf %123, %125 : vector<16x256xf32>
    %127 = arith.addf %119, %126 : vector<16x256xf32>
    %c241_i32_23 = arith.constant 241 : i32
    %128 = tpu.dynamic_rotate %82 by %c241_i32_23 dim 1 : vector<16x256xf32>, i32 -> vector<16x256xf32>
    %129 = vector.extract_strided_slice %2 {offsets = [6, 0], sizes = [1, 256], strides = [1, 1]} : vector<9x256xf32> to vector<1x256xf32>
    %130 = vector.broadcast %129 : vector<1x256xf32> to vector<16x256xf32>
    %131 = arith.mulf %128, %130 : vector<16x256xf32>
    %132 = vector.extract_strided_slice %83 {offsets = [96, 0], sizes = [16, 1], strides = [1, 1]} : vector<144x1xf32> to vector<16x1xf32>
    %133 = vector.broadcast %132 : vector<16x1xf32> to vector<16x256xf32>
    %134 = arith.mulf %131, %133 : vector<16x256xf32>
    %135 = arith.addf %127, %134 : vector<16x256xf32>
    %c240_i32_24 = arith.constant 240 : i32
    %136 = tpu.dynamic_rotate %82 by %c240_i32_24 dim 1 : vector<16x256xf32>, i32 -> vector<16x256xf32>
    %137 = vector.extract_strided_slice %2 {offsets = [7, 0], sizes = [1, 256], strides = [1, 1]} : vector<9x256xf32> to vector<1x256xf32>
    %138 = vector.broadcast %137 : vector<1x256xf32> to vector<16x256xf32>
    %139 = arith.mulf %136, %138 : vector<16x256xf32>
    %140 = vector.extract_strided_slice %83 {offsets = [112, 0], sizes = [16, 1], strides = [1, 1]} : vector<144x1xf32> to vector<16x1xf32>
    %141 = vector.broadcast %140 : vector<16x1xf32> to vector<16x256xf32>
    %142 = arith.mulf %139, %141 : vector<16x256xf32>
    %143 = arith.addf %135, %142 : vector<16x256xf32>
    %c239_i32_25 = arith.constant 239 : i32
    %144 = tpu.dynamic_rotate %82 by %c239_i32_25 dim 1 : vector<16x256xf32>, i32 -> vector<16x256xf32>
    %145 = vector.extract_strided_slice %2 {offsets = [8, 0], sizes = [1, 256], strides = [1, 1]} : vector<9x256xf32> to vector<1x256xf32>
    %146 = vector.broadcast %145 : vector<1x256xf32> to vector<16x256xf32>
    %147 = arith.mulf %144, %146 : vector<16x256xf32>
    %148 = vector.extract_strided_slice %83 {offsets = [128, 0], sizes = [16, 1], strides = [1, 1]} : vector<144x1xf32> to vector<16x1xf32>
    %149 = vector.broadcast %148 : vector<16x1xf32> to vector<16x256xf32>
    %150 = arith.mulf %147, %149 : vector<16x256xf32>
    %151 = arith.addf %143, %150 : vector<16x256xf32>
    %152 = vector.broadcast %84 : vector<16x1xf32> to vector<16x256xf32>
    %153 = arith.addf %151, %152 : vector<16x256xf32>
    %154 = arith.addf %153, %1 : vector<16x256xf32>
    %c0_26 = arith.constant 0 : index
    %c0_27 = arith.constant 0 : index
    %c0_28 = arith.constant 0 : index
    %155 = vector.load %arg9[%c0_26, %c0_27, %c0_28] : memref<1x16x256xf32, #tpu.memory_space<vmem>>, vector<1x16x256xf32>
    %156 = vector.shape_cast %155 : vector<1x16x256xf32> to vector<16x256xf32>
    %157 = vector.shape_cast %154 : vector<16x256xf32> to vector<1x16x256xf32>
    tpu.vector_store %arg9[%c0_26, %c0_27, %c0_28], %157 {strides = array<i32>} : memref<1x16x256xf32, #tpu.memory_space<vmem>>, vector<1x16x256xf32>,
    return
  }
  func.func @transform_0(%arg0: i32) -> (i32, i32, i32) {
    %c0_i32 = arith.constant 0 : i32
    %c0_i32_0 = arith.constant 0 : i32
    %c0_i32_1 = arith.constant 0 : i32
    return %arg0, %c0_i32, %c0_i32_0 : i32, i32, i32
  }
  func.func @transform_1(%arg0: i32) -> (i32, i32) {
    %c0_i32 = arith.constant 0 : i32
    %c0_i32_0 = arith.constant 0 : i32
    %c0_i32_1 = arith.constant 0 : i32
    return %c0_i32, %c0_i32_0 : i32, i32
  }
  func.func @transform_2(%arg0: i32) -> (i32, i32) {
    %c0_i32 = arith.constant 0 : i32
    %c0_i32_0 = arith.constant 0 : i32
    %c0_i32_1 = arith.constant 0 : i32
    return %c0_i32, %c0_i32_0 : i32, i32
  }
  func.func @transform_3(%arg0: i32) -> (i32, i32) {
    %c0_i32 = arith.constant 0 : i32
    %c0_i32_0 = arith.constant 0 : i32
    %c0_i32_1 = arith.constant 0 : i32
    return %c0_i32, %c0_i32_0 : i32, i32
  }
  func.func @transform_4(%arg0: i32) -> (i32, i32) {
    %c0_i32 = arith.constant 0 : i32
    %c0_i32_0 = arith.constant 0 : i32
    %c0_i32_1 = arith.constant 0 : i32
    return %c0_i32, %c0_i32_0 : i32, i32
  }
  func.func @transform_5(%arg0: i32) -> (i32, i32) {
    %c0_i32 = arith.constant 0 : i32
    %c0_i32_0 = arith.constant 0 : i32
    %c0_i32_1 = arith.constant 0 : i32
    return %c0_i32, %c0_i32_0 : i32, i32
  }
  func.func @transform_6(%arg0: i32) -> (i32, i32) {
    %c0_i32 = arith.constant 0 : i32
    %c0_i32_0 = arith.constant 0 : i32
    %c0_i32_1 = arith.constant 0 : i32
    return %c0_i32, %c0_i32_0 : i32, i32
  }
  func.func @transform_7(%arg0: i32) -> (i32, i32) {
    %c0_i32 = arith.constant 0 : i32
    %c0_i32_0 = arith.constant 0 : i32
    %c0_i32_1 = arith.constant 0 : i32
    return %c0_i32, %c0_i32_0 : i32, i32
  }
  func.func @transform_8(%arg0: i32) -> (i32, i32, i32) {
    %c0_i32 = arith.constant 0 : i32
    %c0_i32_0 = arith.constant 0 : i32
    %c0_i32_1 = arith.constant 0 : i32
    return %arg0, %c0_i32, %c0_i32_0 : i32, i32, i32
  }
}

</mosaic_0001>

<bundles_post_ra>
// kernel: tpu_custom_call.1
= control target key start
LH: loop header
LB: loop body
LE: loop exit
PB: predicated region body
PF: predicated region fallthrough
CT: control target
= control target key end

     0   :  { %13 = vsyncpa [#allocation3], 0  ;;  %s2264_s0 = inlined_call_operand.vmem [shape: f32[2,16,256], index: 0, kind: input, shape index: {}]   ;;  %s2265_s1 = inlined_call_operand.vmem [shape: f32[144,1], index: 1, kind: input, shape index: {}]   ;;  %s2266_s2 = inlined_call_operand.vmem [shape: f32[16,1], index: 2, kind: input, shape index: {}]   ;;  %s2267_s3 = inlined_call_operand.vmem [shape: f32[16,16], index: 3, kind: input, shape index: {}]   ;;  %s2268_s4 = inlined_call_operand.vmem [shape: f32[16,1], index: 4, kind: input, shape index: {}]   ;;  %s2269_s5 = inlined_call_operand.vmem [shape: f32[144,1], index: 5, kind: input, shape index: {}]   ;;  %s2270_s6 = inlined_call_operand.vmem [shape: f32[16,1], index: 6, kind: input, shape index: {}]   ;;  %s2271_s7 = inlined_call_operand.vmem [shape: f32[9,256], index: 7, kind: input, shape index: {}]   ;;  %s2272_s8 = inlined_call_operand.hbm [shape: f32[2,16,256], index: 8, kind: output, shape index: {}]  }
   0x1   :  { %15 = vsyncpa [#allocation3 + $0x1], 0  ;;  %s1417_s27 = smov 0   ;;  %s1419_s28 = smov 0  }
   0x2   :  { %s1421_s29 = smov 0   ;;  %s1423_s30 = smov 0  }
   0x3 LB: > { %s1438_s9 = sadd.s32 4294967295, %s1358_s30   ;;  %s1216_s10 = sadd.s32 4294967294, %s1358_s30   ;;  %s1358_s30 = sphi %s1423_s30, %s2316_s30   ;;  %s1354_s29 = sphi %s1421_s29, %s2315_s29   ;;  %s1350_s28 = sphi %s1419_s28, %s2314_s28   ;;  %s1346_s27 = sphi %s1417_s27, %s2313_s27  }
   0x4   : > { %s1442_s11 = sadd.s32 1, %s1358_s30   ;;  %s201_s12 = sadd.s32 1, %s1354_s29 }
   0x5   : > { %s198_s13 = ssub.s32 %s1358_s30, %s1442_s11  ;;  %p211_p0 = scmp.ne.s32.totalorder %s1354_s29, %s1350_s28 }
   0x6   : > { %p199_p1 = scmp.eq.s32.totalorder %s198_s13, 0  ;;  %p212_p2 = scmp.eq.s32.totalorder %s1438_s9, 1 }
   0x7   : > { %p217_p3 = scmp.ne.s32.totalorder %s1350_s28, %s1346_s27  ;;  %p218_p4 = scmp.eq.s32.totalorder %s1216_s10, 1 }
   0x8   : > { %s1453_s14 = scalar_select %p199_p1, %s1354_s29, %s201_s12  }
   0x9   : > { %p1455_p5 = por %p212_p2, %p211_p0  ;;  %p1459_p6 = por %p218_p4, %p217_p3 }
   0xa   : > { %p1219_p7 = scmp.ge.s32.totalorder %s1358_s30, 1  ;;  %p265_p8 = scmp.lt.s32.totalorder %s1358_s30, 3 }
   0xc   : > { %p266_p9 = pnand %p1219_p7, %p265_p8 }
   0xe   : > { %269 = sbr.rel (%p266_p9) target bundleno = 692 (0x2b4), region = 52 }
  0x15   : > { %v320_v0 = vld [vmem:[%s2265_s1 + $0x40] sm:$0xff]  ;;  %p299_p10 = scmp.lt.s32.totalorder %s1438_s9, 1  ;;  %v1360_v2 = vmov 0   ;;  %v321_v3 = vld [vmem:[%s2265_s1 + $0x48] sm:$0xff]  ;;  %v314_v5 = vld [vmem:[%s2265_s1 + $0x10] sm:$0xff]  ;;  %s2283_s18 = smov 15   ;;  %v354_v54 = vlaneseq }
  0x16   : > { %v312_v1 = vld [vmem:[%s2265_s1] sm:$0xff]  ;;  %1291 = vset.pattern.permute.xlu1 %v1360_v2  ;;  %1290 = vset.pattern.permute.xlu0 %v1360_v2  ;;  %v313_v4 = vld [vmem:[%s2265_s1 + $0x8] sm:$0xff]  ;;  %v315_v6 = vld [vmem:[%s2265_s1 + $0x18] sm:$0xff]  ;;  %s2279_s25 = smov 1   ;;  %s2277_s19 = smov 127   ;;  %v1369_v33 = vmov 0.0  }
  0x17   : > { %334 = vperm.xlu0 %1290, %v320_v0   ;;  %375 = vperm.xlu1 %1291, %v312_v1   ;;  %s300_s21 = scalar_select %p299_p10, %s1438_s9, 1  ;;  %v317_v11 = vld [vmem:[%s2265_s1 + $0x28] sm:$0xff]  ;;  %v316_v12 = vld [vmem:[%s2265_s1 + $0x20] sm:$0xff]  ;;  %v319_v13 = vld [vmem:[%s2265_s1 + $0x38] sm:$0xff]  ;;  %v1678_v57 = vshrl.u32 %v354_v54, 7  ;;  %v1684_v60 = vand.u32 127, %v354_v54 }
  0x18   : > { %v318_v14 = vld [vmem:[%s2265_s1 + $0x30] sm:$0xff]  ;;  %v323_v15 = vld [vmem:[%s2265_s1 + $0x58] sm:$0xff]  ;;  %v325_v17 = vld [vmem:[%s2265_s1 + $0x68] sm:$0xff]  ;;  %s2275_s12 = smov 113   ;;  %s2273_s24 = smov 112   ;;  %795 = vmatprep.mubr.f32.mxu0 %v1369_v33  ;;  %801 = vmatprep.mubr.f32.mxu1 %v1369_v33  ;;  %vm724_vm8 = vcmask 130048  }
  0x19   : > { %s1232_s26 = sshll.u32 %s300_s21, 5  ;;  %s1361_s21 = smov 17   ;;  %v322_v16 = vld [vmem:[%s2265_s1 + $0x50] sm:$0xff]  ;;  %v324_v18 = vld [vmem:[%s2265_s1 + $0x60] sm:$0xff]  ;;  %v327_v19 = vld [vmem:[%s2265_s1 + $0x78] sm:$0xff]  ;;  %v363_v61 = vsub.s32 0, %v1678_v57 }
  0x1a   : > { %s1488_s20 = scalar_lea.vmem %s2264_s0, %s1232_s26  ;;  %s1362_s26 = smov 16   ;;  %v326_v20 = vld [vmem:[%s2265_s1 + $0x70] sm:$0xff]  ;;  %v329_v21 = vld [vmem:[%s2265_s1 + $0x88] sm:$0xff]  ;;  %v328_v22 = vld [vmem:[%s2265_s1 + $0x80] sm:$0xff]  ;;  %vm356_vm0 = vcmp.lt.s32.totalorder %v1684_v60, 17  ;;  %v406_v2 = vsub.s32 1, %v1678_v57 }
  0x1b   : > { %339 = vperm.xlu0 %1290, %v321_v3   ;;  %380 = vperm.xlu1 %1291, %v313_v4   ;;  %v1491_v7 = vld [vmem:[%s1488_s20 + $0x10] sm:$0xff]  ;;  %v1494_v8 = vld [vmem:[%s1488_s20] sm:$0xff]  ;;  %v1501_v9 = vld [vmem:[%s1488_s20 + $0x18] sm:$0xff]  ;;  %s2281_s10 = smov 111   ;;  %vm399_vm1 = vcmp.lt.s32.totalorder %v1684_v60, 16  ;;  %vm442_vm2 = vcmp.lt.s32.totalorder %v1684_v60, 15 }
  0x1c   : > { %v1504_v10 = vld [vmem:[%s1488_s20 + $0x8] sm:$0xff]  ;;  %v330_v24 = vld [vmem:[%s2266_s2] sm:$0xff]  ;;  %v815_v31 = vld [vmem:[%s2269_s5 + $0x18] sm:$0xff]  ;;  %vm485_vm3 = vcmp.lt.s32.totalorder %v1684_v60, 1  ;;  %vm528_vm4 = vcmp.lt.s32.totalorder %v1684_v60, 127  ;;  %vm571_vm5 = vcmp.lt.s32.totalorder %v1684_v60, 113 }
  0x1d   : > { %v331_v23 = vld [vmem:[%s2266_s2 + $0x8] sm:$0xff]  ;;  %v712_v26 = vld [vmem:[%s2268_s4] sm:$0xff]  ;;  %v814_v32 = vld [vmem:[%s2269_s5 + $0x10] sm:$0xff]  ;;  %vm614_vm6 = vcmp.lt.s32.totalorder %v1684_v60, 112  ;;  %vm657_vm7 = vcmp.lt.s32.totalorder %v1684_v60, 111  ;;  %s2301_s13 = smov 112  }
  0x1e   : > { %v713_v25 = vld [vmem:[%s2268_s4 + $0x8] sm:$0xff]  ;;  %v820_v28 = vld [vmem:[%s2269_s5 + $0x40] sm:$0xff]  ;;  %v818_v36 = vld [vmem:[%s2269_s5 + $0x30] sm:$0xff]  ;;  %s2302_s17 = smov 111   ;;  %s1370_s23 = smov [#allocation2]  }
  0x1f   : > { %418 = vperm.xlu0 %1290, %v314_v5   ;;  %423 = vperm.xlu1 %1291, %v315_v6   ;;  %v821_v27 = vld [vmem:[%s2269_s5 + $0x48] sm:$0xff]  ;;  %v812_v30 = vld [vmem:[%s2269_s5] sm:$0xff]  ;;  %v819_v37 = vld [vmem:[%s2269_s5 + $0x38] sm:$0xff] }
  0x20   : > { %v813_v29 = vld [vmem:[%s2269_s5 + $0x8] sm:$0xff]  ;;  %v816_v35 = vld [vmem:[%s2269_s5 + $0x20] sm:$0xff]  ;;  %v822_v38 = vld [vmem:[%s2269_s5 + $0x50] sm:$0xff] }
  0x21   : > { %v817_v34 = vld [vmem:[%s2269_s5 + $0x28] sm:$0xff]  ;;  %v823_v39 = vld [vmem:[%s2269_s5 + $0x58] sm:$0xff]  ;;  %v824_v43 = vld [vmem:[%s2269_s5 + $0x60] sm:$0xff] }
  0x22   : > { %v825_v42 = vld [vmem:[%s2269_s5 + $0x68] sm:$0xff]  ;;  %v827_v46 = vld [vmem:[%s2269_s5 + $0x78] sm:$0xff]  ;;  %v826_v47 = vld [vmem:[%s2269_s5 + $0x70] sm:$0xff] }
  0x23   : > { %348 = vrot.lane.b32.xlu1 %v1491_v7, %s1361_s21  ;;  %346 = vrot.lane.b32.xlu0 %v1494_v8, %s1361_s21  ;;  %v829_v50 = vld [vmem:[%s2269_s5 + $0x88] sm:$0xff]  ;;  %v828_v51 = vld [vmem:[%s2269_s5 + $0x80] sm:$0xff] }
  0x24   : > { %v1690_v62 = vld [vmem:[%s2271_s7] sm:$0xff]  ;;  %v1695_v63 = vld [vmem:[%s2271_s7 + $0x8] sm:$0xff] }
  0x25   : > { %v1700_v3 = vrot.slane %v1690_v62, %v363_v61  ;;  %v1703_v4 = vrot.slane %v1695_v63, %v363_v61 }
  0x27   : > { %352 = vrot.lane.b32.xlu1 %v1501_v9, %s1361_s21  ;;  %350 = vrot.lane.b32.xlu0 %v1504_v10, %s1361_s21 }
  0x2b   : > { %466 = vperm.xlu1 %1291, %v317_v11   ;;  %461 = vperm.xlu0 %1290, %v316_v12  }
  0x2f   : > { %393 = vrot.lane.b32.xlu1 %v1491_v7, %s1362_s26  ;;  %391 = vrot.lane.b32.xlu0 %v1494_v8, %s1362_s26 }
  0x33   : > { %397 = vrot.lane.b32.xlu1 %v1501_v9, %s1362_s26  ;;  %395 = vrot.lane.b32.xlu0 %v1504_v10, %s1362_s26 }
  0x37   : > { %509 = vperm.xlu1 %1291, %v319_v13   ;;  %504 = vperm.xlu0 %1290, %v318_v14  }
  0x3b   : > { %436 = vrot.lane.b32.xlu1 %v1491_v7, %s2283_s18  ;;  %434 = vrot.lane.b32.xlu0 %v1494_v8, %s2283_s18 }
  0x3f   : > { %440 = vrot.lane.b32.xlu1 %v1501_v9, %s2283_s18  ;;  %438 = vrot.lane.b32.xlu0 %v1504_v10, %s2283_s18  ;;  %s2299_s18 = smov 127  }
  0x43   : > { %552 = vperm.xlu1 %1291, %v323_v15   ;;  %547 = vperm.xlu0 %1290, %v322_v16   ;;  %v1715_v15 = vrot.slane %v1690_v62, %v406_v2  ;;  %v1718_v16 = vrot.slane %v1695_v63, %v406_v2 }
  0x47   : > { %479 = vrot.lane.b32.xlu1 %v1491_v7, %s2279_s25  ;;  %477 = vrot.lane.b32.xlu0 %v1494_v8, %s2279_s25 }
  0x4b   : > { %483 = vrot.lane.b32.xlu1 %v1501_v9, %s2279_s25  ;;  %481 = vrot.lane.b32.xlu0 %v1504_v10, %s2279_s25  ;;  %s2297_s25 = smov 15  }
  0x4f   : > { %595 = vperm.xlu1 %1291, %v325_v17   ;;  %590 = vperm.xlu0 %1290, %v324_v18  }
  0x53   : > { %522 = vrot.lane.b32.xlu1 %v1491_v7, %s2277_s19  ;;  %520 = vrot.lane.b32.xlu0 %v1494_v8, %s2277_s19 }
  0x57   : > { %526 = vrot.lane.b32.xlu1 %v1501_v9, %s2277_s19  ;;  %524 = vrot.lane.b32.xlu0 %v1504_v10, %s2277_s19  ;;  %s2298_s19 = smov 1  }
  0x5b   : > { %638 = vperm.xlu1 %1291, %v327_v19   ;;  %633 = vperm.xlu0 %1290, %v326_v20  }
  0x5f   : > { %565 = vrot.lane.b32.xlu1 %v1491_v7, %s2275_s12  ;;  %563 = vrot.lane.b32.xlu0 %v1494_v8, %s2275_s12 }
  0x63   : > { %569 = vrot.lane.b32.xlu1 %v1501_v9, %s2275_s12  ;;  %567 = vrot.lane.b32.xlu0 %v1504_v10, %s2275_s12 }
  0x67   : > { %681 = vperm.xlu1 %1291, %v329_v21   ;;  %676 = vperm.xlu0 %1290, %v328_v22  }
  0x6b   : > { %608 = vrot.lane.b32.xlu1 %v1491_v7, %s2273_s24  ;;  %606 = vrot.lane.b32.xlu0 %v1494_v8, %s2273_s24 }
  0x6f   : > { %612 = vrot.lane.b32.xlu1 %v1501_v9, %s2273_s24  ;;  %610 = vrot.lane.b32.xlu0 %v1504_v10, %s2273_s24  ;;  %s296_s24 = sand.u32 1, %s1350_s28  }
  0x73   : > { %651 = vrot.lane.b32.xlu1 %v1491_v7, %s2281_s10  ;;  %649 = vrot.lane.b32.xlu0 %v1494_v8, %s2281_s10 }
  0x77   : > { %655 = vrot.lane.b32.xlu1 %v1501_v9, %s2281_s10  ;;  %653 = vrot.lane.b32.xlu0 %v1504_v10, %s2281_s10  ;;  %s2300_s10 = smov 113  }
  0x7b   : > { %699 = vperm.xlu1 %1291, %v331_v23   ;;  %694 = vperm.xlu0 %1290, %v330_v24  }
  0x7f   : > { %721 = vperm.xlu1 %1291, %v713_v25   ;;  %716 = vperm.xlu0 %1290, %v712_v26  }
  0x83   : > { %839 = vperm.xlu1 %1291, %v821_v27   ;;  %834 = vperm.xlu0 %1290, %v820_v28   ;;  %v449_v27 = vsub.s32 2, %v1678_v57 }
  0x87   : > { %869 = vperm.xlu1 %1291, %v813_v29   ;;  %864 = vperm.xlu0 %1290, %v812_v30  }
  0x8b   : > { %903 = vperm.xlu1 %1291, %v815_v31   ;;  %898 = vperm.xlu0 %1290, %v814_v32  }
  0x8f   : > { %937 = vperm.xlu1 %1291, %v817_v34   ;;  %932 = vperm.xlu0 %1290, %v816_v35  }
  0x93   : > { %966 = vperm.xlu1 %1291, %v818_v36   ;;  %971 = vperm.xlu0 %1290, %v819_v37  }
  0x96   : > { %v1650_v40 = vpop.permute.xlu0 %334  ;;  %v1652_v41 = vpop.permute.xlu1 %375 }
  0x97   : > { %1000 = vperm.xlu1 %1291, %v822_v38   ;;  %1005 = vperm.xlu0 %1290, %v823_v39   ;;  %v1745_v38 = vrot.slane %v1690_v62, %v449_v27  ;;  %v1748_v39 = vrot.slane %v1695_v63, %v449_v27 }
  0x9a   : > { %v1660_v44 = vpop.permute.xlu0 %339  ;;  %v381_v45 = vpop.permute.xlu1 %380 }
  0x9b   : > { %1039 = vperm.xlu1 %1291, %v825_v42   ;;  %1034 = vperm.xlu0 %1290, %v824_v43   ;;  %v342_v42 = vmul.f32 %v1650_v40, %v1494_v8  ;;  %v343_v43 = vmul.f32 %v1650_v40, %v1504_v10 }
  0x9e   : > { %v1668_v48 = vpop.permute.xlu0 %418  ;;  %v1670_v49 = vpop.permute.xlu1 %423 }
  0x9f   : > { %1073 = vperm.xlu1 %1291, %v827_v46   ;;  %1068 = vperm.xlu0 %1290, %v826_v47  }
  0xa2   : > { %v349_v52 = vpop.permute.xlu1 %348  ;;  %v347_v53 = vpop.permute.xlu0 %346 }
  0xa3   : > { %1107 = vperm.xlu1 %1291, %v829_v50   ;;  %1102 = vperm.xlu0 %1290, %v828_v51  }
  0xa6   : > { %v353_v55 = vpop.permute.xlu1 %352  ;;  %v351_v56 = vpop.permute.xlu0 %350 }
  0xa7   : > { %v358_v5 = vsel %vm356_vm0, %v349_v52, %v353_v55  ;;  %v360_v6 = vsel %vm356_vm0, %v353_v55, %v349_v52  ;;  %v357_v11 = vsel %vm356_vm0, %v347_v53, %v351_v56  ;;  %v359_v12 = vsel %vm356_vm0, %v351_v56, %v347_v53 }
  0xa8   : > { %v371_v17 = vmul.f32 %v1700_v3, %v360_v6  ;;  %v372_v18 = vmul.f32 %v1703_v4, %v358_v5  ;;  %v369_v19 = vmul.f32 %v1700_v3, %v359_v12  ;;  %v370_v20 = vmul.f32 %v1703_v4, %v357_v11 }
  0xaa   : > { %v1680_v58 = vpop.permute.xlu1 %466  ;;  %v1682_v59 = vpop.permute.xlu0 %461  ;;  %v385_v32 = vmul.f32 %v381_v45, %v371_v17  ;;  %v386_v33 = vmul.f32 %v381_v45, %v372_v18  ;;  %v383_v34 = vmul.f32 %v1652_v41, %v369_v19  ;;  %v384_v35 = vmul.f32 %v1652_v41, %v370_v20 }
  0xab   : > { %v344_v45 = vmul.f32 %v1660_v44, %v1491_v7  ;;  %v345_v41 = vmul.f32 %v1660_v44, %v1501_v9 }
  0xac   : > { %v387_v8 = vadd.f32 %v383_v34, %v342_v42  ;;  %v388_v54 = vadd.f32 %v384_v35, %v343_v43  ;;  %v492_v34 = vsub.s32 3, %v1678_v57 }
  0xad   : > { %v389_v52 = vadd.f32 %v385_v32, %v344_v45  ;;  %v390_v53 = vadd.f32 %v386_v33, %v345_v41 }
  0xae   : > { %v394_v0 = vpop.permute.xlu1 %393  ;;  %v392_v1 = vpop.permute.xlu0 %391  ;;  %v1804_v42 = vrot.slane %v1695_v63, %v492_v34 }
  0xb2   : > { %v398_v13 = vpop.permute.xlu1 %397  ;;  %v396_v14 = vpop.permute.xlu0 %395 }
  0xb3   : > { %v401_v21 = vsel %vm399_vm1, %v394_v0, %v398_v13  ;;  %v403_v22 = vsel %vm399_vm1, %v398_v13, %v394_v0  ;;  %v400_v23 = vsel %vm399_vm1, %v392_v1, %v396_v14  ;;  %v402_v24 = vsel %vm399_vm1, %v396_v14, %v392_v1 }
  0xb4   : > { %v414_v28 = vmul.f32 %v1715_v15, %v403_v22  ;;  %v415_v29 = vmul.f32 %v1718_v16, %v401_v21  ;;  %v412_v30 = vmul.f32 %v1715_v15, %v402_v24  ;;  %v413_v31 = vmul.f32 %v1718_v16, %v400_v23 }
  0xb6   : > { %v1732_v25 = vpop.permute.xlu1 %509  ;;  %v1734_v26 = vpop.permute.xlu0 %504  ;;  %v428_v46 = vmul.f32 %v1670_v49, %v414_v28  ;;  %v429_v47 = vmul.f32 %v1670_v49, %v415_v29  ;;  %v426_v50 = vmul.f32 %v1668_v48, %v412_v30  ;;  %v427_v51 = vmul.f32 %v1668_v48, %v413_v31 }
  0xb8   : > { %v432_v0 = vadd.f32 %v428_v46, %v389_v52  ;;  %v433_v1 = vadd.f32 %v429_v47, %v390_v53  ;;  %v430_v2 = vadd.f32 %v426_v50, %v387_v8  ;;  %v431_v5 = vadd.f32 %v427_v51, %v388_v54 }
  0xb9   : > { %v535_v51 = vsub.s32 5, %v1678_v57  ;;  %v578_v52 = vsub.s32 6, %v1678_v57 }
  0xba   : > { %v437_v36 = vpop.permute.xlu1 %436  ;;  %v435_v37 = vpop.permute.xlu0 %434 }
  0xbe   : > { %v441_v55 = vpop.permute.xlu1 %440  ;;  %v439_v10 = vpop.permute.xlu0 %438 }
  0xbf   : > { %v444_v7 = vsel %vm442_vm2, %v437_v36, %v441_v55  ;;  %v446_v9 = vsel %vm442_vm2, %v441_v55, %v437_v36  ;;  %v443_v40 = vsel %vm442_vm2, %v435_v37, %v439_v10  ;;  %v445_v44 = vsel %vm442_vm2, %v439_v10, %v435_v37 }
  0xc0   : > { %v457_v48 = vmul.f32 %v1745_v38, %v446_v9  ;;  %v458_v49 = vmul.f32 %v1748_v39, %v444_v7  ;;  %v455_v56 = vmul.f32 %v1745_v38, %v445_v44  ;;  %v456_v61 = vmul.f32 %v1748_v39, %v443_v40 }
  0xc1   : > { %v1801_v37 = vrot.slane %v1690_v62, %v492_v34  ;;  %v621_v9 = vsub.s32 7, %v1678_v57  ;;  %v1827_v40 = vrot.slane %v1690_v62, %v535_v51  ;;  %v1830_v44 = vrot.slane %v1695_v63, %v535_v51 }
  0xc2   : > { %v471_v6 = vmul.f32 %v1680_v58, %v457_v48  ;;  %v472_v11 = vmul.f32 %v1680_v58, %v458_v49  ;;  %v469_v12 = vmul.f32 %v1682_v59, %v455_v56  ;;  %v470_v13 = vmul.f32 %v1682_v59, %v456_v61  ;;  %v1778_v14 = vpop.permute.xlu1 %552  ;;  %v1780_v17 = vpop.permute.xlu0 %547 }
  0xc3   : > { %v1834_v48 = vrot.slane %v1690_v62, %v578_v52 }
  0xc4   : > { %v1782_v18 = vadd.f32 %v471_v6, %v432_v0  ;;  %v1784_v19 = vadd.f32 %v472_v11, %v433_v1  ;;  %v1786_v20 = vadd.f32 %v469_v12, %v430_v2  ;;  %v1788_v21 = vadd.f32 %v470_v13, %v431_v5 }
  0xc5   : > { %v1849_v6 = vrot.slane %v1695_v63, %v578_v52  ;;  %v1856_v12 = vrot.slane %v1695_v63, %v621_v9 }
  0xc6   : > { %v480_v22 = vpop.permute.xlu1 %479  ;;  %v478_v23 = vpop.permute.xlu0 %477 }
  0xca   : > { %v484_v24 = vpop.permute.xlu1 %483  ;;  %v482_v58 = vpop.permute.xlu0 %481 }
  0xcb   : > { %v487_v43 = vsel %vm485_vm3, %v480_v22, %v484_v24  ;;  %v489_v45 = vsel %vm485_vm3, %v484_v24, %v480_v22  ;;  %v486_v41 = vsel %vm485_vm3, %v478_v23, %v482_v58  ;;  %v488_v46 = vsel %vm485_vm3, %v482_v58, %v478_v23 }
  0xcc   : > { %v500_v53 = vmul.f32 %v1801_v37, %v489_v45  ;;  %v501_v8 = vmul.f32 %v1804_v42, %v487_v43  ;;  %v498_v54 = vmul.f32 %v1801_v37, %v488_v46  ;;  %v499_v55 = vmul.f32 %v1804_v42, %v486_v41 }
  0xce   : > { %v1790_v27 = vpop.permute.xlu1 %595  ;;  %v1792_v28 = vpop.permute.xlu0 %590  ;;  %v514_v49 = vmul.f32 %v1732_v25, %v500_v53  ;;  %v515_v56 = vmul.f32 %v1732_v25, %v501_v8  ;;  %v512_v61 = vmul.f32 %v1734_v26, %v498_v54  ;;  %v513_v0 = vmul.f32 %v1734_v26, %v499_v55 }
  0xcf   : > { %v1853_v26 = vrot.slane %v1690_v62, %v621_v9 }
  0xd0   : > { %v517_v34 = vadd.f32 %v513_v0, %v1788_v21 }
  0xd2   : > { %v523_v59 = vpop.permute.xlu1 %522  ;;  %v521_v29 = vpop.permute.xlu0 %520 }
  0xd6   : > { %v527_v30 = vpop.permute.xlu1 %526  ;;  %v525_v31 = vpop.permute.xlu0 %524 }
  0xd7   : > { %v530_v57 = vsel %vm528_vm4, %v523_v59, %v527_v30  ;;  %v532_v1 = vsel %vm528_vm4, %v527_v30, %v523_v59  ;;  %v529_v2 = vsel %vm528_vm4, %v521_v29, %v525_v31  ;;  %v531_v5 = vsel %vm528_vm4, %v525_v31, %v521_v29 }
  0xd8   : > { %v543_v58 = vmul.f32 %v1827_v40, %v530_v57  ;;  %v544_v62 = vmul.f32 %v1830_v44, %v532_v1  ;;  %v541_v59 = vmul.f32 %v1827_v40, %v529_v2  ;;  %v542_v63 = vmul.f32 %v1830_v44, %v531_v5 }
  0xd9   : > { %v518_v29 = vadd.f32 %v514_v49, %v1782_v18  ;;  %v519_v30 = vadd.f32 %v515_v56, %v1784_v19  ;;  %v516_v31 = vadd.f32 %v512_v61, %v1786_v20 }
  0xda   : > { %v1794_v32 = vpop.permute.xlu1 %638  ;;  %v1796_v33 = vpop.permute.xlu0 %633  ;;  %v557_v21 = vmul.f32 %v1778_v14, %v543_v58  ;;  %v555_v51 = vmul.f32 %v1780_v17, %v541_v59  ;;  %v556_v52 = vmul.f32 %v1780_v17, %v542_v63 }
  0xdc   : > { %v561_v17 = vadd.f32 %v557_v21, %v518_v29  ;;  %v559_v1 = vadd.f32 %v555_v51, %v516_v31  ;;  %v560_v2 = vadd.f32 %v556_v52, %v517_v34 }
  0xde   : > { %v566_v35 = vpop.permute.xlu1 %565  ;;  %v564_v36 = vpop.permute.xlu0 %563 }
  0xe2   : > { %v570_v47 = vpop.permute.xlu1 %569  ;;  %v568_v50 = vpop.permute.xlu0 %567 }
  0xe3   : > { %v573_v13 = vsel %vm571_vm5, %v566_v35, %v570_v47  ;;  %v575_v22 = vsel %vm571_vm5, %v570_v47, %v566_v35  ;;  %v572_v23 = vsel %vm571_vm5, %v564_v36, %v568_v50  ;;  %v574_v24 = vsel %vm571_vm5, %v568_v50, %v564_v36 }
  0xe4   : > { %v586_v35 = vmul.f32 %v1834_v48, %v573_v13  ;;  %v587_v36 = vmul.f32 %v1849_v6, %v575_v22  ;;  %v584_v43 = vmul.f32 %v1834_v48, %v572_v23  ;;  %v585_v45 = vmul.f32 %v1849_v6, %v574_v24  ;;  %v1911_v13 = vld [vmem:[%s2271_s7 + $0x18] ss:$0 sm:$0xff] }
  0xe5   : > { %v558_v50 = vmul.f32 %v1778_v14, %v544_v62  ;;  %2296 = vst [vmem:[#allocation6_spill] sm:$0xff] %v1911_v13 }
  0xe6   : > { %v1821_v10 = vpop.permute.xlu1 %681  ;;  %v1823_v7 = vpop.permute.xlu0 %676  ;;  %v600_v9 = vmul.f32 %v1790_v27, %v586_v35  ;;  %v601_v49 = vmul.f32 %v1790_v27, %v587_v36  ;;  %v598_v56 = vmul.f32 %v1792_v28, %v584_v43  ;;  %v599_v14 = vmul.f32 %v1792_v28, %v585_v45  ;;  %v1906_v28 = vld [vmem:[%s2271_s7 + $0x10] ss:$0 sm:$0xff] }
  0xe7   : > { %v562_v57 = vadd.f32 %v558_v50, %v519_v30  ;;  %2295 = vst [vmem:[#allocation5_spill] sm:$0xff] %v1906_v28 }
  0xe8   : > { %v604_v22 = vadd.f32 %v600_v9, %v561_v17  ;;  %v602_v24 = vadd.f32 %v598_v56, %v559_v1  ;;  %v603_v58 = vadd.f32 %v599_v14, %v560_v2  ;;  %v711_v17 = vld [vmem:[%s2267_s3 + $0x8] sm:$0xff] }
  0xe9   : > { %v605_v23 = vadd.f32 %v601_v49, %v562_v57 }
  0xea   : > { %v609_v25 = vpop.permute.xlu1 %608  ;;  %v607_v11 = vpop.permute.xlu0 %606 }
  0xee   : > { %v613_v41 = vpop.permute.xlu1 %612  ;;  %v611_v46 = vpop.permute.xlu0 %610 }
  0xef   : > { %v616_v47 = vsel %vm614_vm6, %v609_v25, %v613_v41  ;;  %v618_v18 = vsel %vm614_vm6, %v613_v41, %v609_v25  ;;  %v615_v19 = vsel %vm614_vm6, %v607_v11, %v611_v46  ;;  %v617_v20 = vsel %vm614_vm6, %v611_v46, %v607_v11 }
  0xf0   : > { %v629_v53 = vmul.f32 %v1853_v26, %v616_v47  ;;  %v630_v8 = vmul.f32 %v1856_v12, %v618_v18  ;;  %v627_v54 = vmul.f32 %v1853_v26, %v615_v19  ;;  %v628_v55 = vmul.f32 %v1856_v12, %v617_v20 }
  0xf2   : > { %v652_v61 = vpop.permute.xlu1 %651  ;;  %v650_v0 = vpop.permute.xlu0 %649  ;;  %v643_v5 = vmul.f32 %v1794_v32, %v629_v53  ;;  %v644_v25 = vmul.f32 %v1794_v32, %v630_v8  ;;  %v641_v11 = vmul.f32 %v1796_v33, %v627_v54  ;;  %v642_v27 = vmul.f32 %v1796_v33, %v628_v55 }
  0xf4   : > { %v648_v36 = vadd.f32 %v644_v25, %v605_v23  ;;  %v647_v43 = vadd.f32 %v643_v5, %v604_v22  ;;  %v646_v45 = vadd.f32 %v642_v27, %v603_v58  ;;  %v645_v41 = vadd.f32 %v641_v11, %v602_v24 }
  0xf6   : > { %v656_v62 = vpop.permute.xlu1 %655  ;;  %v654_v32 = vpop.permute.xlu0 %653 }
  0xf7   : > { %v659_v59 = vsel %vm657_vm7, %v652_v61, %v656_v62  ;;  %v661_v33 = vsel %vm657_vm7, %v656_v62, %v652_v61  ;;  %v658_v63 = vsel %vm657_vm7, %v650_v0, %v654_v32  ;;  %v660_v29 = vsel %vm657_vm7, %v654_v32, %v650_v0 }
  0xf8   : > { %v672_v30 = vmul.f32 %v1906_v28, %v659_v59  ;;  %v673_v31 = vmul.f32 %v1911_v13, %v661_v33  ;;  %v670_v34 = vmul.f32 %v1906_v28, %v658_v63  ;;  %v671_v35 = vmul.f32 %v1911_v13, %v660_v29  ;;  %v831_v33 = vld [vmem:[%s2270_s6 + $0x8] sm:$0xff]  ;;  %v830_v63 = vld [vmem:[%s2270_s6] sm:$0xff] }
  0xfa   : > { %v686_v46 = vmul.f32 %v1821_v10, %v672_v30  ;;  %v687_v47 = vmul.f32 %v1821_v10, %v673_v31  ;;  %v684_v18 = vmul.f32 %v1823_v7, %v670_v34  ;;  %v685_v19 = vmul.f32 %v1823_v7, %v671_v35  ;;  %v700_v52 = vpop.permute.xlu1 %699  ;;  %v695_v53 = vpop.permute.xlu0 %694  ;;  %v710_v7 = vld [vmem:[%s2267_s3] sm:$0xff] }
  0xfc   : > { %v691_v20 = vadd.f32 %v687_v47, %v648_v36  ;;  %v690_v21 = vadd.f32 %v686_v46, %v647_v43  ;;  %v689_v50 = vadd.f32 %v685_v19, %v646_v45  ;;  %v688_v51 = vadd.f32 %v684_v18, %v645_v41 }
  0xfe   : > { %v704_v8 = vadd.f32 %v700_v52, %v690_v21  ;;  %v705_v54 = vadd.f32 %v700_v52, %v691_v20  ;;  %v702_v55 = vadd.f32 %v695_v53, %v688_v51  ;;  %v703_v9 = vadd.f32 %v695_v53, %v689_v50  ;;  %v722_v57 = vpop.permute.xlu1 %721  ;;  %v717_v1 = vpop.permute.xlu0 %716 }
 0x100   : > { %v708_v49 = vmax.f32 %v704_v8, 0.0  ;;  %v709_v56 = vmax.f32 %v705_v54, 0.0  ;;  %v706_v14 = vmax.f32 %v702_v55, 0.0  ;;  %v707_v61 = vmax.f32 %v703_v9, 0.0 }
 0x102   : > { %v1234_v0 = vpack.c.bf16 %v709_v56, %v707_v61  ;;  %v1236_v10 = vpack.c.bf16 %v708_v49, %v706_v14  ;;  %v840_v29 = vpop.permute.xlu1 %839  ;;  %v835_v30 = vpop.permute.xlu0 %834 }
 0x104   : > { %1235 = vmatprep.subr.bf16.mxu0 %v1234_v0  ;;  %1238 = vmatprep.subr.bf16.mxu1 %v1234_v0 }
 0x105   : > { %1237 = vmatpush1.bf16.msra.mxu0 %v1236_v10  ;;  %1239 = vmatpush1.bf16.msra.mxu1 %v1236_v10 }
 0x106   : > { %v870_v31 = vpop.permute.xlu1 %869  ;;  %v865_v34 = vpop.permute.xlu0 %864 }
 0x108   : > { %1225 = vmatmul.mubr.msk.f32.vlgmr.msra.gmra.mrb[0].mxu0 %vm724_vm8, %v710_v7  ;;  %1226 = vmatmul.mubr.msk.f32.vlgmr.msra.gmra.mrb[0].mxu1 %vm724_vm8, %v711_v17 }
 0x10a   : > { %v2013_v35 = vpop.permute.xlu1 %903  ;;  %v2015_v36 = vpop.permute.xlu0 %898 }
 0x10e   : > { %v2017_v43 = vpop.permute.xlu1 %937  ;;  %v2019_v45 = vpop.permute.xlu0 %932 }
 0x112   : > { %v2021_v41 = vpop.permute.xlu1 %966  ;;  %v2023_v46 = vpop.permute.xlu0 %971 }
 0x116   : > { %v2025_v47 = vpop.permute.xlu1 %1000  ;;  %v2027_v18 = vpop.permute.xlu0 %1005 }
 0x11a   : > { %v2029_v19 = vpop.permute.xlu1 %1039  ;;  %v2031_v20 = vpop.permute.xlu0 %1034 }
 0x11e   : > { %v2033_v21 = vpop.permute.xlu1 %1073  ;;  %v2035_v50 = vpop.permute.xlu0 %1068 }
 0x122   : > { %v2037_v51 = vpop.permute.xlu1 %1107  ;;  %v2039_v52 = vpop.permute.xlu0 %1102 }
 0x123   : > { %2303 = vst [vmem:[#allocation7_spill] sm:$0xff] %v2037_v51  ;;  %2304 = vst [vmem:[#allocation8_spill] sm:$0xff] %v2039_v52 }
 0x1db   : > { %v797_v2 = vpop.f32.mrb[0].mxu0  ;;  %v803_v5 = vpop.f32.mrb[0].mxu1 }
 0x1dc   : > { %v798_v25 = vadd.f32 %v797_v2, %v717_v1  ;;  %v804_v11 = vadd.f32 %v803_v5, %v722_v57  ;;  %v799_v27 = vpop.f32.mrb[1].mxu0  ;;  %v805_v22 = vpop.f32.mrb[1].mxu1 }
 0x1dd   : > { %v800_v58 = vadd.f32 %v799_v27, %v717_v1  ;;  %v806_v62 = vadd.f32 %v805_v22, %v722_v57 }
 0x1de   : > { %v1935_v23 = vmax.f32 %v798_v25, 0.0  ;;  %v1937_v24 = vmax.f32 %v804_v11, 0.0 }
 0x1df   : > { %v1971_v32 = vmax.f32 %v800_v58, 0.0  ;;  %v1973_v59 = vmax.f32 %v806_v62, 0.0 }
 0x1e0   : > { %848 = vrot.lane.b32.xlu1 %v1937_v24, %s1361_s21  ;;  %846 = vrot.lane.b32.xlu0 %v1935_v23, %s1361_s21 }
 0x1e4   : > { %882 = vrot.lane.b32.xlu1 %v1937_v24, %s1362_s26  ;;  %880 = vrot.lane.b32.xlu0 %v1935_v23, %s1362_s26 }
 0x1e8   : > { %916 = vrot.lane.b32.xlu1 %v1937_v24, %s2297_s25  ;;  %914 = vrot.lane.b32.xlu0 %v1935_v23, %s2297_s25 }
 0x1ec   : > { %950 = vrot.lane.b32.xlu1 %v1937_v24, %s2298_s19  ;;  %948 = vrot.lane.b32.xlu0 %v1935_v23, %s2298_s19 }
 0x1f0   : > { %984 = vrot.lane.b32.xlu1 %v1937_v24, %s2299_s18  ;;  %982 = vrot.lane.b32.xlu0 %v1935_v23, %s2299_s18 }
 0x1f4   : > { %1018 = vrot.lane.b32.xlu1 %v1937_v24, %s2300_s10  ;;  %1016 = vrot.lane.b32.xlu0 %v1935_v23, %s2300_s10 }
 0x1f8   : > { %1052 = vrot.lane.b32.xlu1 %v1937_v24, %s2301_s13  ;;  %1050 = vrot.lane.b32.xlu0 %v1935_v23, %s2301_s13 }
 0x1fc   : > { %1086 = vrot.lane.b32.xlu1 %v1937_v24, %s2302_s17  ;;  %1084 = vrot.lane.b32.xlu0 %v1935_v23, %s2302_s17 }
 0x200   : > { %852 = vrot.lane.b32.xlu1 %v1973_v59, %s1361_s21  ;;  %850 = vrot.lane.b32.xlu0 %v1971_v32, %s1361_s21  ;;  %s2222_s21 = scalar_lea.sflag [#allocation3], %s296_s24 }
 0x204   : > { %886 = vrot.lane.b32.xlu1 %v1973_v59, %s1362_s26  ;;  %884 = vrot.lane.b32.xlu0 %v1971_v32, %s1362_s26 }
 0x208   : > { %920 = vrot.lane.b32.xlu1 %v1973_v59, %s2297_s25  ;;  %918 = vrot.lane.b32.xlu0 %v1971_v32, %s2297_s25  ;;  %s1220_s25 = sshll.u32 %s296_s24, 5 }
 0x20c   : > { %954 = vrot.lane.b32.xlu1 %v1973_v59, %s2298_s19  ;;  %952 = vrot.lane.b32.xlu0 %v1971_v32, %s2298_s19  ;;  %s298_s19 = scalar_lea.vmem [#allocation2], %s1220_s25 }
 0x210   : > { %988 = vrot.lane.b32.xlu1 %v1973_v59, %s2299_s18  ;;  %986 = vrot.lane.b32.xlu0 %v1971_v32, %s2299_s18  ;;  %s1154_s18 = sshll.u32 %s298_s19, 4  ;;  %s2211_s18 = int_to_ptr.vmem [resolvable:$true] %s1154_s18 }
 0x211   : > { %s1296_s22 = scalar_lea.vmem %s2211_s18, 512 }
 0x212   : > { %p1297_p11 = scmp.ne.s32.totalorder %s2211_s18, %s1296_s22 }
 0x214   : > { %1022 = vrot.lane.b32.xlu1 %v1973_v59, %s2300_s10  ;;  %1020 = vrot.lane.b32.xlu0 %v1971_v32, %s2300_s10  ;;  %s1233_s10 = sshll.u32 %s1438_s9, 9  ;;  %p1298_p12 = pnand %p1297_p11, %p1455_p5 }
 0x216   : > { %p1299_p13 = pneg %p1298_p12 }
 0x218   : > { %1056 = vrot.lane.b32.xlu1 %v1973_v59, %s2301_s13  ;;  %1054 = vrot.lane.b32.xlu0 %v1971_v32, %s2301_s13 }
 0x21c   : > { %1090 = vrot.lane.b32.xlu1 %v1973_v59, %s2302_s17  ;;  %1088 = vrot.lane.b32.xlu0 %v1971_v32, %s2302_s17  ;;  %s2220_s17 = scalar_lea.hbm %s2272_s8, %s1233_s10 }
 0x220   : > { %1125 = vperm.xlu1 %1291, %v831_v33   ;;  %1120 = vperm.xlu0 %1290, %v830_v63  }
 0x252   : > { %v849_v53 = vpop.permute.xlu1 %848  ;;  %v847_v8 = vpop.permute.xlu0 %846 }
 0x256   : > { %v883_v54 = vpop.permute.xlu1 %882  ;;  %v881_v55 = vpop.permute.xlu0 %880 }
 0x25a   : > { %v917_v9 = vpop.permute.xlu1 %916  ;;  %v915_v49 = vpop.permute.xlu0 %914 }
 0x25e   : > { %v2041_v56 = vpop.permute.xlu1 %950  ;;  %v2043_v14 = vpop.permute.xlu0 %948 }
 0x262   : > { %v2045_v61 = vpop.permute.xlu1 %984  ;;  %v2047_v0 = vpop.permute.xlu0 %982 }
 0x266   : > { %v2049_v10 = vpop.permute.xlu1 %1018  ;;  %v2051_v7 = vpop.permute.xlu0 %1016 }
 0x26a   : > { %v2053_v17 = vpop.permute.xlu1 %1052  ;;  %v2055_v57 = vpop.permute.xlu0 %1050 }
 0x26e   : > { %v2057_v1 = vpop.permute.xlu1 %1086  ;;  %v2059_v2 = vpop.permute.xlu0 %1084 }
 0x26f   : > { %2305 = vst [vmem:[#allocation9_spill] sm:$0xff] %v2057_v1  ;;  %2306 = vst [vmem:[#allocation10_spill] sm:$0xff] %v2059_v2 }
 0x272   : > { %v853_v5 = vpop.permute.xlu1 %852  ;;  %v851_v25 = vpop.permute.xlu0 %850 }
 0x273   : > { %v855_v11 = vsel %vm356_vm0, %v849_v53, %v853_v5  ;;  %v857_v27 = vsel %vm356_vm0, %v853_v5, %v849_v53  ;;  %v854_v22 = vsel %vm356_vm0, %v847_v8, %v851_v25  ;;  %v856_v58 = vsel %vm356_vm0, %v851_v25, %v847_v8 }
 0x274   : > { %v860_v62 = vmul.f32 %v857_v27, %v1700_v3  ;;  %v861_v33 = vmul.f32 %v855_v11, %v1703_v4  ;;  %v858_v63 = vmul.f32 %v856_v58, %v1700_v3  ;;  %v859_v52 = vmul.f32 %v854_v22, %v1703_v4 }
 0x275   : > { %v845_v4 = vmul.f32 %v840_v29, %v1973_v59 }
 0x276   : > { %v874_v51 = vmul.f32 %v870_v31, %v860_v62  ;;  %v875_v13 = vmul.f32 %v870_v31, %v861_v33  ;;  %v872_v28 = vmul.f32 %v865_v34, %v858_v63  ;;  %v873_v2 = vmul.f32 %v865_v34, %v859_v52  ;;  %v887_v1 = vpop.permute.xlu1 %886  ;;  %v885_v53 = vpop.permute.xlu0 %884 }
 0x277   : > { %v889_v5 = vsel %vm399_vm1, %v883_v54, %v887_v1  ;;  %v891_v8 = vsel %vm399_vm1, %v887_v1, %v883_v54  ;;  %v888_v25 = vsel %vm399_vm1, %v881_v55, %v885_v53  ;;  %v890_v3 = vsel %vm399_vm1, %v885_v53, %v881_v55 }
 0x278   : > { %v844_v31 = vmul.f32 %v840_v29, %v1937_v24  ;;  %v843_v34 = vmul.f32 %v835_v30, %v1971_v32  ;;  %v842_v52 = vmul.f32 %v835_v30, %v1935_v23  ;;  %v894_v11 = vmul.f32 %v891_v8, %v1715_v15 }
 0x279   : > { %v895_v27 = vmul.f32 %v889_v5, %v1718_v16  ;;  %v892_v54 = vmul.f32 %v890_v3, %v1715_v15  ;;  %v893_v1 = vmul.f32 %v888_v25, %v1718_v16  ;;  %v879_v58 = vadd.f32 %v875_v13, %v845_v4 }
 0x27a   : > { %v878_v22 = vadd.f32 %v874_v51, %v844_v31  ;;  %v876_v62 = vadd.f32 %v872_v28, %v842_v52  ;;  %v877_v55 = vadd.f32 %v873_v2, %v843_v34  ;;  %v921_v33 = vpop.permute.xlu1 %920  ;;  %v919_v59 = vpop.permute.xlu0 %918  ;;  %v908_v24 = vmul.f32 %v2013_v35, %v894_v11 }
 0x27b   : > { %v909_v32 = vmul.f32 %v2013_v35, %v895_v27  ;;  %v906_v23 = vmul.f32 %v2015_v36, %v892_v54  ;;  %v907_v29 = vmul.f32 %v2015_v36, %v893_v1  ;;  %v923_v30 = vsel %vm442_vm2, %v917_v9, %v921_v33 }
 0x27c   : > { %v925_v15 = vsel %vm442_vm2, %v921_v33, %v917_v9  ;;  %v922_v16 = vsel %vm442_vm2, %v915_v49, %v919_v59  ;;  %v924_v28 = vsel %vm442_vm2, %v919_v59, %v915_v49  ;;  %v912_v13 = vadd.f32 %v908_v24, %v878_v22 }
 0x27d   : > { %v913_v51 = vadd.f32 %v909_v32, %v879_v58  ;;  %v910_v2 = vadd.f32 %v906_v23, %v876_v62  ;;  %v911_v35 = vadd.f32 %v907_v29, %v877_v55  ;;  %v928_v63 = vmul.f32 %v925_v15, %v1745_v38 }
 0x27e   : > { %v929_v36 = vmul.f32 %v923_v30, %v1748_v39  ;;  %v926_v53 = vmul.f32 %v924_v28, %v1745_v38  ;;  %v927_v5 = vmul.f32 %v922_v16, %v1748_v39  ;;  %v955_v8 = vpop.permute.xlu1 %954  ;;  %v953_v9 = vpop.permute.xlu0 %952 }
 0x27f   : > { %v957_v25 = vsel %vm485_vm3, %v2041_v56, %v955_v8  ;;  %v959_v49 = vsel %vm485_vm3, %v955_v8, %v2041_v56  ;;  %v956_v3 = vsel %vm485_vm3, %v2043_v14, %v953_v9  ;;  %v958_v38 = vsel %vm485_vm3, %v953_v9, %v2043_v14 }
 0x280   : > { %v942_v39 = vmul.f32 %v2017_v43, %v928_v63  ;;  %v943_v4 = vmul.f32 %v2017_v43, %v929_v36  ;;  %v940_v31 = vmul.f32 %v2019_v45, %v926_v53  ;;  %v941_v34 = vmul.f32 %v2019_v45, %v927_v5 }
 0x281   : > { %v962_v52 = vmul.f32 %v959_v49, %v1801_v37  ;;  %v963_v56 = vmul.f32 %v957_v25, %v1804_v42  ;;  %v960_v11 = vmul.f32 %v958_v38, %v1801_v37  ;;  %v961_v27 = vmul.f32 %v956_v3, %v1804_v42 }
 0x282   : > { %v946_v54 = vadd.f32 %v942_v39, %v912_v13  ;;  %v947_v1 = vadd.f32 %v943_v4, %v913_v51  ;;  %v944_v22 = vadd.f32 %v940_v31, %v910_v2  ;;  %v945_v14 = vadd.f32 %v941_v34, %v911_v35  ;;  %v989_v58 = vpop.permute.xlu1 %988  ;;  %v987_v62 = vpop.permute.xlu0 %986 }
 0x283   : > { %v976_v43 = vmul.f32 %v2023_v46, %v962_v52  ;;  %v977_v55 = vmul.f32 %v2023_v46, %v963_v56  ;;  %v974_v45 = vmul.f32 %v2021_v41, %v960_v11  ;;  %v975_v33 = vmul.f32 %v2021_v41, %v961_v27 }
 0x284   : > { %v991_v37 = vsel %vm528_vm4, %v2045_v61, %v989_v58  ;;  %v993_v42 = vsel %vm528_vm4, %v989_v58, %v2045_v61  ;;  %v990_v59 = vsel %vm528_vm4, %v2047_v0, %v987_v62  ;;  %v992_v46 = vsel %vm528_vm4, %v987_v62, %v2047_v0  ;;  %v2307_v62 = vld [vmem:[#allocation9_spill] sm:$0xff] }
 0x285   : > { %v980_v24 = vadd.f32 %v976_v43, %v946_v54  ;;  %v981_v32 = vadd.f32 %v977_v55, %v947_v1  ;;  %v978_v23 = vadd.f32 %v974_v45, %v944_v22  ;;  %v979_v41 = vadd.f32 %v975_v33, %v945_v14  ;;  %v2308_v43 = vld [vmem:[#allocation10_spill] sm:$0xff]  ;;  %v2309_v45 = vld [vmem:[#allocation5_spill] sm:$0xff] }
 0x286   : > { %v996_v29 = vmul.f32 %v991_v37, %v1827_v40  ;;  %v997_v30 = vmul.f32 %v993_v42, %v1830_v44  ;;  %v994_v15 = vmul.f32 %v990_v59, %v1827_v40  ;;  %v995_v61 = vmul.f32 %v992_v46, %v1830_v44  ;;  %v1023_v16 = vpop.permute.xlu1 %1022  ;;  %v1021_v28 = vpop.permute.xlu0 %1020 }
 0x287   : > { %v1025_v13 = vsel %vm571_vm5, %v2049_v10, %v1023_v16  ;;  %v1027_v0 = vsel %vm571_vm5, %v1023_v16, %v2049_v10  ;;  %v1024_v51 = vsel %vm571_vm5, %v2051_v7, %v1021_v28  ;;  %v1026_v40 = vsel %vm571_vm5, %v1021_v28, %v2051_v7 }
 0x288   : > { %v1010_v44 = vmul.f32 %v2027_v18, %v996_v29  ;;  %v1011_v2 = vmul.f32 %v2027_v18, %v997_v30  ;;  %v1008_v35 = vmul.f32 %v2025_v47, %v994_v15  ;;  %v1009_v63 = vmul.f32 %v2025_v47, %v995_v61  ;;  %v2312_v15 = vld [vmem:[#allocation8_spill] sm:$0xff] }
 0x289   : > { %v1030_v36 = vmul.f32 %v1025_v13, %v1834_v48  ;;  %v1031_v10 = vmul.f32 %v1027_v0, %v1849_v6  ;;  %v1028_v53 = vmul.f32 %v1024_v51, %v1834_v48  ;;  %v1029_v5 = vmul.f32 %v1026_v40, %v1849_v6 }
 0x28a   : > { %v1014_v8 = vadd.f32 %v1010_v44, %v980_v24  ;;  %v1015_v9 = vadd.f32 %v1011_v2, %v981_v32  ;;  %v1012_v25 = vadd.f32 %v1008_v35, %v978_v23  ;;  %v1013_v7 = vadd.f32 %v1009_v63, %v979_v41  ;;  %v1057_v49 = vpop.permute.xlu1 %1056  ;;  %v1055_v3 = vpop.permute.xlu0 %1054  ;;  %v2311_v41 = vld [vmem:[#allocation7_spill] sm:$0xff] }
 0x28b   : > { %v1044_v18 = vmul.f32 %v2029_v19, %v1030_v36  ;;  %v1045_v38 = vmul.f32 %v2029_v19, %v1031_v10  ;;  %v1042_v47 = vmul.f32 %v2031_v20, %v1028_v53  ;;  %v1043_v39 = vmul.f32 %v2031_v20, %v1029_v5  ;;  %v1292_v36 = vld [vmem:[%s1488_s20 + $0x10] sm:$0xff]  ;;  %v1293_v53 = vld [vmem:[%s1488_s20 + $0x18] sm:$0xff] }
 0x28c   : > { %v1059_v48 = vsel %vm614_vm6, %v2053_v17, %v1057_v49  ;;  %v1061_v6 = vsel %vm614_vm6, %v1057_v49, %v2053_v17  ;;  %v1058_v4 = vsel %vm614_vm6, %v2055_v57, %v1055_v3  ;;  %v1060_v19 = vsel %vm614_vm6, %v1055_v3, %v2055_v57 }
 0x28d   : > { %v1064_v31 = vmul.f32 %v1059_v48, %v1853_v26  ;;  %v1065_v20 = vmul.f32 %v1061_v6, %v1856_v12  ;;  %v1062_v34 = vmul.f32 %v1058_v4, %v1853_v26  ;;  %v1063_v52 = vmul.f32 %v1060_v19, %v1856_v12 }
 0x28e   : > { %v1091_v56 = vpop.permute.xlu1 %1090  ;;  %v1089_v11 = vpop.permute.xlu0 %1088  ;;  %v1049_v27 = vadd.f32 %v1045_v38, %v1015_v9  ;;  %v1048_v17 = vadd.f32 %v1044_v18, %v1014_v8  ;;  %v1047_v54 = vadd.f32 %v1043_v39, %v1013_v7  ;;  %v1046_v1 = vadd.f32 %v1042_v47, %v1012_v25  ;;  %v1294_v8 = vld [vmem:[%s1488_s20] sm:$0xff]  ;;  %v1295_v25 = vld [vmem:[%s1488_s20 + $0x8] sm:$0xff]  ;;  %s1300_s20 = sshll.u32 %s1370_s23, 4  ;;  %s1301_s20 = int_to_ptr.vmem [resolvable:$false] %s1300_s20 }
 0x28f   : > { %v1078_v22 = vmul.f32 %v2033_v21, %v1064_v31  ;;  %v1079_v14 = vmul.f32 %v2033_v21, %v1065_v20  ;;  %v1076_v57 = vmul.f32 %v2035_v50, %v1062_v34  ;;  %v1077_v58 = vmul.f32 %v2035_v50, %v1063_v52  ;;  %v2310_v50 = vld [vmem:[#allocation6_spill] sm:$0xff]  ;;  %s1302_s12 = scalar_lea.vmem %s1301_s20, 1024  ;;  %p1303_p0 = scmp.lt.s32.totalorder %s2211_s18, %s1301_s20 }
 0x290   : > { %v1093_v26 = vsel %vm657_vm7, %v2307_v62, %v1091_v56  ;;  %v1095_v12 = vsel %vm657_vm7, %v1091_v56, %v2307_v62  ;;  %v1092_v55 = vsel %vm657_vm7, %v2308_v43, %v1089_v11  ;;  %v1094_v21 = vsel %vm657_vm7, %v1089_v11, %v2308_v43  ;;  %p1304_p1 = scmp.lt.s32.totalorder %s1302_s12, %s1296_s22 }
 0x291   : > { %v1098_v33 = vmul.f32 %v2309_v45, %v1093_v26  ;;  %v1099_v37 = vmul.f32 %v2310_v50, %v1095_v12  ;;  %v1096_v42 = vmul.f32 %v2309_v45, %v1092_v55  ;;  %v1097_v59 = vmul.f32 %v2310_v50, %v1094_v21 }
 0x292   : > { %v1083_v46 = vadd.f32 %v1079_v14, %v1049_v27  ;;  %v1082_v24 = vadd.f32 %v1078_v22, %v1048_v17  ;;  %v1081_v32 = vadd.f32 %v1077_v58, %v1047_v54  ;;  %v1080_v23 = vadd.f32 %v1076_v57, %v1046_v1  ;;  %p1305_p2 = por %p1304_p1, %p1303_p0 }
 0x293   : > { %v1112_v29 = vmul.f32 %v2311_v41, %v1098_v33  ;;  %v1113_v30 = vmul.f32 %v2311_v41, %v1099_v37  ;;  %v1110_v60 = vmul.f32 %v2312_v15, %v1096_v42  ;;  %v1111_v61 = vmul.f32 %v2312_v15, %v1097_v59 }
 0x294   : > { %p1306_p3 = pnand %p1305_p2, %p1299_p13 }
 0x295   : > { %v1117_v16 = vadd.f32 %v1113_v30, %v1083_v46  ;;  %v1116_v28 = vadd.f32 %v1112_v29, %v1082_v24  ;;  %v1115_v13 = vadd.f32 %v1111_v61, %v1081_v32  ;;  %v1114_v0 = vadd.f32 %v1110_v60, %v1080_v23 }
 0x29f   : > { %v1126_v51 = vpop.permute.xlu1 %1125  ;;  %v1121_v40 = vpop.permute.xlu0 %1120 }
 0x2a0   : > { %v1130_v44 = vadd.f32 %v1126_v51, %v1116_v28  ;;  %v1131_v2 = vadd.f32 %v1126_v51, %v1117_v16  ;;  %v1128_v35 = vadd.f32 %v1121_v40, %v1114_v0  ;;  %v1129_v63 = vadd.f32 %v1121_v40, %v1115_v13 }
 0x2a2   : > { %v1134_v10 = vadd.f32 %v1292_v36, %v1130_v44  ;;  %v1135_v5 = vadd.f32 %v1293_v53, %v1131_v2  ;;  %v1132_v9 = vadd.f32 %v1294_v8, %v1128_v35  ;;  %v1133_v7 = vadd.f32 %v1295_v25, %v1129_v63 }
 0x2a4   : > { %1138 = vst [vmem:[%s298_s19 + $0x10] sm:$0xff] %v1134_v10  ;;  %1139 = vst [vmem:[%s298_s19 + $0x18] sm:$0xff] %v1135_v5 }
 0x2a5   : > { %1136 = vst [vmem:[%s298_s19] sm:$0xff] %v1132_v9  ;;  %1137 = vst [vmem:[%s298_s19 + $0x8] sm:$0xff] %v1133_v7 }
 0x2a6   : > { %1309 = shalt.err (!%p1306_p3)
}
 0x2a7   : > { %s1310_s24 = scalar_lea.hbm %s2220_s17, 512  ;;  %s1314_s10 = scalar_lea.hbm %s2272_s8, 1024 }
 0x2a8   : > { %p1311_p4 = scmp.ne.s32.totalorder %s2220_s17, %s1310_s24  ;;  %p1315_p9 = scmp.lt.u32.totalorder %s2220_s17, %s2272_s8 }
 0x2a9   : > { %p1316_p10 = scmp.lt.u32.totalorder %s1314_s10, %s1310_s24  ;;  %p1318_p12 = scmp.lt.u32.totalorder %s1310_s24, %s2220_s17 }
 0x2aa   : > { %p1312_p7 = pnand %p1311_p4, %p1455_p5 }
 0x2ab   : > { %p1317_p11 = por %p1316_p10, %p1315_p9 }
 0x2ac   : > { %p1313_p8 = pneg %p1312_p7 }
 0x2ad   : > { %p1319_p13 = por %p1318_p12, %p1317_p11 }
 0x2af   : > { %p1320_p0 = pnand %p1319_p13, %p1313_p8 }
 0x2b1   : > { %1323 = shalt.err (!%p1320_p0)
}
 0x2b2   : > { %s1371_s22 = smov 256  }
 0x2b3   : > { %1240 = dma.vmem_to_hbm [thread:$0]  (%p1455_p5), %s2211_s18, 512, %s2220_s17, %s2222_s21, %s1371_s22, %s1371_s22, %s1362_s26  }
 0x2b4 PF: > { %p1246_p1 = scmp.ge.s32.totalorder %s1358_s30, 2  ;;  %s1169_s23 = sand.u32 1, %s1346_s27  }
 0x2b5   : > { %s1170_s20 = scalar_lea.sflag [#allocation3], %s1169_s23 }
 0x2b6   : > { %p1243_p2 = pnand %p1246_p1, %p1459_p6 }
 0x2b8   : > { %1341 = dma.done.wait (!%p1243_p2), %s1170_s20, 512  }
 0x2b9   : > { %1343 = vsyncadd (!%p1243_p2), %s1170_s20, 4294966784  ;;  %p18_p3 = scmp.ge.s32.totalorder %s1442_s11, 4   ;;  %s2313_s27 = smov %s1350_s28 }
 0x2ba   : > { %s2314_s28 = smov %s1354_s29  ;;  %s2315_s29 = smov %s1453_s14 }
 0x2bb   : > { %s2316_s30 = smov %s1442_s11  ;;  %20 = sbr.rel (!%p18_p3) target bundleno = 3 (0x3), region = 87 }
 0x2c2   :  { %1175 = vsyncpa [#allocation3], 1 }
 0x2c3   :  { %1177 = vsyncpa [#allocation3 + $0x1], 1 }

</bundles_post_ra>
